<compile_context>
chip_gen: v6e
topology: v6e:2x2x1
jax: 0.10.0
libtpu: 0.0.40
codegen_flags: <defaults>
</compile_context>

<pallas_src>
import functools

import jax
import jax.numpy as jnp
from jax.experimental import pallas as pl
from jax.experimental.pallas import tpu as pltpu

_EPS = 1e-5


# ----------------------------------------------------------------------------
# Fully fused ExpansiveLayer Pallas kernel (single block, no grid)
# ----------------------------------------------------------------------------
def _expansive_kernel(skip_ref, x_ref, u_ref, m_ref,
                      w1_ref, p1_ref, w2_ref, p2_ref,
                      o_ref, slab_ref,
                      *, N, Cs, Cx, Cout, Cpad, H, W, eps):
    """Whole ExpansiveLayer forward in VMEM.

      skip_ref: (N*Cs, H*W)      skip_x, NCHW-flattened (pure reshape, no transpose)
      x_ref   : (N*Cx, H1*W1)    x, NCHW-flattened
      u_ref   : (H1*W1, H*W)     kron(A_h_pad, A_w_pad)^T: upsample x2 + F.pad
      m_ref   : (9, N*H*W)       per-tap border-validity masks (zero padding)
      w1_ref  : (Cpad, 9*Cin)    bf16 stage-1 weights (M padded to Cpad)
      p1_ref  : (3*Cpad, 1)      [bias; gamma; beta] stage 1 (padded rows = 0)
      w2_ref  : (Cout, 9*Cpad)   bf16 stage-2 weights (zero K cols for pad chans)
      p2_ref  : (3*Cout, 1)      [bias; gamma; beta] stage 2
      o_ref   : (N*Cout, H*W)    output, NCHW-flattened (lane-dense stores)
      slab_ref: (Cin, N*H*W)     VMEM scratch: channel-major concat slab
    """
    HW = H * W
    NP = N * HW
    Cin = Cs + Cx
    inv_np = 1.0 / NP

    # ---- glue (fused): bilinear upsample x2 + zero-pad placement as ONE matmul
    xu = jnp.dot(x_ref[...], u_ref[...],
                 preferred_element_type=jnp.float32)            # (N*Cx, HW)

    # ---- glue (fused): concat([skip_x, x_up], channel) assembled channel-major
    # slab rows = channels (sublanes), lanes ordered (n, h, w).
    for n in range(N):
        lanes = slice(n * HW, (n + 1) * HW)                     # lane-aligned (256)
        slab_ref[0:Cs, lanes] = skip_ref[n * Cs:(n + 1) * Cs, :]
        slab_ref[Cs:Cin, lanes] = xu[n * Cx:(n + 1) * Cx, :]

    def conv_bn_relu(x, w, b, g, be):
        # im2col on the lane axis: 9 rolled copies of x; any roll that crosses
        # an image border lands on a lane whose precomputed mask is 0, so
        # zero-padding (padding=1) semantics hold and batches never mix.
        taps = []
        t = 0
        for dy in (-1, 0, 1):
            for dx in (-1, 0, 1):
                s = dy * W + dx
                shifted = x if s == 0 else pltpu.roll(x, shift=(-s) % NP, axis=1)
                if dy == 0 and dx == 0:
                    taps.append(shifted)
                else:
                    taps.append(shifted * m_ref[t:t + 1, :])     # f32 mask mult
                t += 1
        # Every tap is a full 8-sublane tile (Cin/Cpad are multiples of 8), so
        # this concat is sublane-aligned — no retiling copies.
        im2col = jnp.concatenate(taps, axis=0).astype(jnp.bfloat16)
        # Single MXU matmul per stage: bf16 operands, f32 accumulation.
        # TODO(synk): at production channel counts, tile Cout >= 128 per dot so
        # the 128/256-wide MXU is not left mostly idle (harmless at M=4/8 here).
        y = jnp.dot(w, im2col, preferred_element_type=jnp.float32) + b
        # BatchNorm2d with training-mode batch statistics over (N, H, W) ==
        # the lane axis (whole reduction domain resident), then affine + ReLU.
        # NOTE: all NP lanes are real pixels here; a production tiling that
        # pads N*H*W up to a lane multiple must mask padded lanes out of the
        # sums or the stats will be biased.
        mean = jnp.sum(y, axis=1, keepdims=True) * inv_np
        c = y - mean
        var = jnp.sum(c * c, axis=1, keepdims=True) * inv_np
        scale = g * jax.lax.rsqrt(var + eps)
        return jnp.maximum(c * scale + be, 0.0)

    # ---- stage 1: M padded to Cpad so the stage-2 input is already a full
    # 8-sublane tile (padded channels are exactly zero end-to-end).
    h1 = conv_bn_relu(slab_ref[...], w1_ref[...],
                      p1_ref[0:Cpad, :],
                      p1_ref[Cpad:2 * Cpad, :],
                      p1_ref[2 * Cpad:3 * Cpad, :])              # (Cpad, NP)
    # ---- stage 2: consumes stage-1 output directly (no HBM round-trip).
    h2 = conv_bn_relu(h1, w2_ref[...],
                      p2_ref[0:Cout, :],
                      p2_ref[Cout:2 * Cout, :],
                      p2_ref[2 * Cout:3 * Cout, :])              # (Cout, NP)

    # ---- write NCHW-flattened output (N*Cout, H*W): lane-dense (256) stores;
    # the wrapper reshape back to (N, Cout, H, W) is a free bitcast.
    for n in range(N):
        o_ref[n * Cout:(n + 1) * Cout, :] = h2[:, n * HW:(n + 1) * HW]


# ----------------------------------------------------------------------------
# Shape-only constant builders (const-folded by XLA under jit)
# ----------------------------------------------------------------------------
def _interp_matrix(n_in, n_out):
    """Row-stochastic bilinear interpolation matrix (align_corners=True)."""
    if n_in == 1:
        return jnp.ones((n_out, 1), jnp.float32)
    src = jnp.arange(n_out, dtype=jnp.float32) * (n_in - 1) / (n_out - 1)
    lo = jnp.clip(jnp.floor(src), 0, n_in - 2).astype(jnp.int32)
    frac = src - lo.astype(jnp.float32)
    rows = jnp.arange(n_out)
    A = jnp.zeros((n_out, n_in), jnp.float32)
    A = A.at[rows, lo].add(1.0 - frac)
    A = A.at[rows, lo + 1].add(frac)
    return A


def _upsample_pad_matrix(H1, W1, H2, W2):
    """(H1*W1, H2*W2): x2 bilinear upsample (align_corners=True) fused with the
    F.pad zero placement to the skip_x spatial size (matches F.pad ordering)."""
    A_h = _interp_matrix(H1, 2 * H1)
    A_w = _interp_matrix(W1, 2 * W1)
    dh, dw = H2 - 2 * H1, W2 - 2 * W1
    A_hp = jnp.zeros((H2, H1), jnp.float32).at[dh // 2:dh // 2 + 2 * H1, :].set(A_h)
    A_wp = jnp.zeros((W2, W1), jnp.float32).at[dw // 2:dw // 2 + 2 * W1, :].set(A_w)
    U = jnp.einsum('ab,cd->acbd', A_hp, A_wp).reshape(H2 * W2, H1 * W1)
    return jnp.transpose(U)


def _tap_masks(N, H, W):
    """(9, N*H*W) f32 validity masks for the 9 conv taps (zero-padding borders).
    Precomputed from shapes only — no per-lane div/mod inside the kernel."""
    ys = jnp.arange(H)
    xs = jnp.arange(W)
    rows = []
    for dy in (-1, 0, 1):
        for dx in (-1, 0, 1):
            my = ((ys + dy >= 0) & (ys + dy < H)).astype(jnp.float32)
            mx = ((xs + dx >= 0) & (xs + dx < W)).astype(jnp.float32)
            rows.append(jnp.tile((my[:, None] * mx[None, :]).reshape(-1), N))
    return jnp.stack(rows, axis=0)


# ----------------------------------------------------------------------------
# ExpansiveLayer forward: one pallas_call, wrapper does only free reshapes
# ----------------------------------------------------------------------------
@jax.jit
def expansive_layer_forward(x_nchw, skip_nchw, params):
    N, Cx, H1, W1 = x_nchw.shape
    _, Cs, H2, W2 = skip_nchw.shape
    Cin = Cs + Cx
    Cout = params['w1'].shape[-1]
    Cpad = -(-Cout // 8) * 8            # stage-1 out channels padded to 8-sublane tile
    HW = H2 * W2
    NP = N * HW

    # Pure reshapes (free): no wrapper transpose / pad / concat of activations.
    x_flat = x_nchw.reshape(N * Cx, H1 * W1)
    skip_flat = skip_nchw.reshape(N * Cs, HW)

    # Shape-only constants (folded by XLA).
    u_t = _upsample_pad_matrix(H1, W1, H2, W2)            # (H1*W1, HW)
    masks = _tap_masks(N, H2, W2)                         # (9, NP)

    # One-time weight / BN-param repacking (tiny; done once at load time in prod).
    # w1: (9, Cin, Cout) -> (Cpad, 9*Cin), tap-major then Cin, bf16 for the MXU.
    w1 = jnp.transpose(params['w1'], (2, 0, 1)).reshape(Cout, 9 * Cin)
    w1 = jnp.pad(w1, ((0, Cpad - Cout), (0, 0))).astype(jnp.bfloat16)
    # w2: (9, Cout, Cout) -> (Cout, 9*Cpad) with zero K columns for pad channels.
    w2 = jnp.transpose(params['w2'], (2, 0, 1))           # (Cout, 9, Cout)
    w2 = jnp.pad(w2, ((0, 0), (0, 0), (0, Cpad - Cout))).reshape(Cout, 9 * Cpad)
    w2 = w2.astype(jnp.bfloat16)
    padv = lambda v: jnp.pad(v, (0, Cpad - Cout))
    p1 = jnp.concatenate([padv(params['b1']), padv(params['g1']),
                          padv(params['be1'])]).reshape(3 * Cpad, 1)
    p2 = jnp.concatenate([params['b2'], params['g2'],
                          params['be2']]).reshape(3 * Cout, 1)

    kern = functools.partial(_expansive_kernel, N=N, Cs=Cs, Cx=Cx, Cout=Cout,
                             Cpad=Cpad, H=H2, W=W2, eps=_EPS)
    vmem = pl.BlockSpec(memory_space=pltpu.MemorySpace.VMEM)
    # Whole problem fits in VMEM at these sizes: single block, no grid, ONE launch.
    # TODO(synk): production resolutions need a grid (rows with a 1-row halo):
    #   size tiles for v7x's 64 MiB physical / 32 MiB scoped VMEM (count the 9x
    #   im2col + 2x double-buffering), raise vmem_limit_bytes on v5e (16 MiB
    #   scoped default), mark independent axes
    #   dimension_semantics=("parallel", ..., "arbitrary") for v7x's 2 cores,
    #   and give BN a resident stats accumulator / per-core combine.
    out_flat = pl.pallas_call(
        kern,
        out_shape=jax.ShapeDtypeStruct((N * Cout, HW), jnp.float32),
        in_specs=[vmem] * 8,
        out_specs=vmem,
        scratch_shapes=[pltpu.VMEM((Cin, NP), jnp.float32)],
    )(skip_flat, x_flat, u_t, masks, w1, p1, w2, p2)

    return out_flat.reshape(N, Cout, H2, W2)              # NCHW, free reshape


# ----------------------------------------------------------------------------
# Pure-JAX reference (correctness check, f32)
# ----------------------------------------------------------------------------
def _ref_conv_bn_relu(x_nhwc, w, b, g, be, eps=_EPS):
    k3 = w.reshape(3, 3, w.shape[1], w.shape[2])
    y = jax.lax.conv_general_dilated(
        x_nhwc, k3, (1, 1), 'SAME',
        dimension_numbers=('NHWC', 'HWIO', 'NHWC')) + b
    mean = jnp.mean(y, axis=(0, 1, 2))
    var = jnp.var(y, axis=(0, 1, 2))          # biased variance (PyTorch fwd)
    yhat = (y - mean) * jax.lax.rsqrt(var + eps)
    return jnp.maximum(yhat * g + be, 0.0)


def ref_forward(x_nchw, skip_nchw, params):
    N, Cx, H1, W1 = x_nchw.shape
    A_h = _interp_matrix(H1, 2 * H1)
    A_w = _interp_matrix(W1, 2 * W1)
    x_up = jnp.einsum('oh,pw,nchw->ncop', A_h, A_w, x_nchw)
    dh = skip_nchw.shape[2] - x_up.shape[2]
    dw = skip_nchw.shape[3] - x_up.shape[3]
    x_up = jnp.pad(x_up, ((0, 0), (0, 0),
                          (dh // 2, dh - dh // 2),
                          (dw // 2, dw - dw // 2)))
    cat = jnp.concatenate([skip_nchw, x_up], axis=1)
    h = jnp.transpose(cat, (0, 2, 3, 1))
    h = _ref_conv_bn_relu(h, params['w1'], params['b1'], params['g1'], params['be1'])
    h = _ref_conv_bn_relu(h, params['w2'], params['b2'], params['g2'], params['be2'])
    return jnp.transpose(h, (0, 3, 1, 2))


# ----------------------------------------------------------------------------
# Main
# ----------------------------------------------------------------------------
if __name__ == "__main__":
    key = jax.random.PRNGKey(0)
    ks = jax.random.split(key, 10)

    # ExpansiveLayer(in_channels=8, out_channels=4):
    #   x: (B, 4, 8, 8), skip_x: (B, 4, 16, 16); concat channels = 4 + 4 = 8.
    B, Cx, H1, W1 = 2, 4, 8, 8
    Cout = 4
    Cin = Cx + Cout                                   # ConvLayer in_channels = 8

    x = jax.random.normal(ks[0], (B, Cx, H1, W1), jnp.float32)
    skip_x = jax.random.normal(ks[1], (B, Cout, 2 * H1, 2 * W1), jnp.float32)

    # Deterministic synthetic parameters (shapes match the PyTorch module).
    # Conv weights stored as (9, Cin, Cout) == (kH*kW, Cin, Cout) "HWIO" order.
    params = dict(
        w1=0.1 * jax.random.normal(ks[2], (9, Cin, Cout), jnp.float32),
        b1=0.1 * jax.random.normal(ks[3], (Cout,), jnp.float32),
        g1=1.0 + 0.1 * jax.random.normal(ks[4], (Cout,), jnp.float32),
        be1=0.1 * jax.random.normal(ks[5], (Cout,), jnp.float32),
        w2=0.1 * jax.random.normal(ks[6], (9, Cout, Cout), jnp.float32),
        b2=0.1 * jax.random.normal(ks[7], (Cout,), jnp.float32),
        g2=1.0 + 0.1 * jax.random.normal(ks[8], (Cout,), jnp.float32),
        be2=0.1 * jax.random.normal(ks[9], (Cout,), jnp.float32),
    )

    out = jax.block_until_ready(expansive_layer_forward(x, skip_x, params))
    assert out.shape == (B, Cout, 2 * H1, 2 * W1), out.shape

    ref = jax.block_until_ready(ref_forward(x, skip_x, params))
    err = float(jnp.max(jnp.abs(out - ref)))
    # 5e-2 abs on O(1) post-BN/ReLU outputs: covers bf16 MXU operands (per the
    # perf review) vs. the f32 reference across two conv+BN stages; layout /
    # fusion / masking bugs produce O(1) errors and would still trip this.
    if err < 5e-2:
        print("KERNEL_OK")
    else:
        print(f"MISMATCH max_abs_err={err}")
</pallas_src>

<mosaic_0001>
module attributes {stable_mosaic.version = 11 : i64} {
  func.func private @main(%arg0: i32) attributes {dimension_semantics = [#tpu.dimension_semantics<core_parallel>], iteration_bounds = array<i64: 2>, tpu.core_type = #tpu.core_type<sc_scalar_subcore>, window_params = []} {
    return
  }
}

module attributes {stable_mosaic.version = 11 : i64} {
  func.func private @main(%arg0: i32) attributes {dimension_semantics = [#tpu.dimension_semantics<core_parallel>], iteration_bounds = array<i64: 2>, tpu.core_type = #tpu.core_type<sc_scalar_subcore>, window_params = []} {
    return
  }
}

module attributes {stable_mosaic.version = 11 : i64} {
  func.func @_expansive_kernel(%arg0: memref<8x256xf32, #tpu.memory_space<vmem>>, %arg1: memref<8x64xf32, #tpu.memory_space<vmem>>, %arg2: memref<64x256xf32, #tpu.memory_space<vmem>>, %arg3: memref<9x512xf32, #tpu.memory_space<vmem>>, %arg4: memref<8x72xbf16, #tpu.memory_space<vmem>>, %arg5: memref<24x1xf32, #tpu.memory_space<vmem>>, %arg6: memref<4x72xbf16, #tpu.memory_space<vmem>>, %arg7: memref<12x1xf32, #tpu.memory_space<vmem>>, %arg8: memref<8x256xf32, #tpu.memory_space<vmem>>, %arg9: memref<8x512xf32, #tpu.memory_space<vmem>>) attributes {dimension_semantics = [], scalar_prefetch = 0 : i64, scratch_operands = 1 : i64, tpu.core_type = #tpu.core_type<tc>} {
    %c0 = arith.constant 0 : index
    %c0_0 = arith.constant 0 : index
    %0 = vector.load %arg1[%c0, %c0_0] : memref<8x64xf32, #tpu.memory_space<vmem>>, vector<8x64xf32>
    %c0_1 = arith.constant 0 : index
    %c0_2 = arith.constant 0 : index
    %1 = vector.load %arg2[%c0_1, %c0_2] : memref<64x256xf32, #tpu.memory_space<vmem>>, vector<64x256xf32>
    %cst = arith.constant dense<0.000000e+00> : vector<8x256xf32>
    %2 = tpu.matmul %0, %1, %cst {dimension_numbers = #tpu.dot_dimension_numbers<[1], [0], [0], [1], [0, 0, 1, 1], [], []>} : vector<8x64xf32>, vector<64x256xf32>, vector<8x256xf32> -> vector<8x256xf32>
    %c0_3 = arith.constant 0 : index
    %c0_4 = arith.constant 0 : index
    %3 = vector.load %arg0[%c0_3, %c0_4] : memref<8x256xf32, #tpu.memory_space<vmem>>, vector<4x256xf32>
    %c0_5 = arith.constant 0 : index
    %c0_6 = arith.constant 0 : index
    %4 = vector.load %arg9[%c0_5, %c0_6] : memref<8x512xf32, #tpu.memory_space<vmem>>, vector<4x256xf32>
    tpu.vector_store %arg9[%c0_5, %c0_6], %3 {strides = array<i32>} : memref<8x512xf32, #tpu.memory_space<vmem>>, vector<4x256xf32>,
    %5 = vector.extract_strided_slice %2 {offsets = [0, 0], sizes = [4, 256], strides = [1, 1]} : vector<8x256xf32> to vector<4x256xf32>
    %c4 = arith.constant 4 : index
    %c0_7 = arith.constant 0 : index
    %6 = vector.load %arg9[%c4, %c0_7] : memref<8x512xf32, #tpu.memory_space<vmem>>, vector<4x256xf32>
    tpu.vector_store %arg9[%c4, %c0_7], %5 {strides = array<i32>} : memref<8x512xf32, #tpu.memory_space<vmem>>, vector<4x256xf32>,
    %c4_8 = arith.constant 4 : index
    %c0_9 = arith.constant 0 : index
    %7 = vector.load %arg0[%c4_8, %c0_9] : memref<8x256xf32, #tpu.memory_space<vmem>>, vector<4x256xf32>
    %c0_10 = arith.constant 0 : index
    %c256 = arith.constant 256 : index
    %8 = vector.load %arg9[%c0_10, %c256] : memref<8x512xf32, #tpu.memory_space<vmem>>, vector<4x256xf32>
    tpu.vector_store %arg9[%c0_10, %c256], %7 {strides = array<i32>} : memref<8x512xf32, #tpu.memory_space<vmem>>, vector<4x256xf32>,
    %9 = vector.extract_strided_slice %2 {offsets = [4, 0], sizes = [4, 256], strides = [1, 1]} : vector<8x256xf32> to vector<4x256xf32>
    %c4_11 = arith.constant 4 : index
    %c256_12 = arith.constant 256 : index
    %10 = vector.load %arg9[%c4_11, %c256_12] : memref<8x512xf32, #tpu.memory_space<vmem>>, vector<4x256xf32>
    tpu.vector_store %arg9[%c4_11, %c256_12], %9 {strides = array<i32>} : memref<8x512xf32, #tpu.memory_space<vmem>>, vector<4x256xf32>,
    %c0_13 = arith.constant 0 : index
    %c0_14 = arith.constant 0 : index
    %11 = vector.load %arg9[%c0_13, %c0_14] : memref<8x512xf32, #tpu.memory_space<vmem>>, vector<8x512xf32>
    %c0_15 = arith.constant 0 : index
    %c0_16 = arith.constant 0 : index
    %12 = vector.load %arg4[%c0_15, %c0_16] : memref<8x72xbf16, #tpu.memory_space<vmem>>, vector<8x72xbf16>
    %c0_17 = arith.constant 0 : index
    %c0_18 = arith.constant 0 : index
    %13 = vector.load %arg5[%c0_17, %c0_18] : memref<24x1xf32, #tpu.memory_space<vmem>>, vector<8x1xf32>
    %c8 = arith.constant 8 : index
    %c0_19 = arith.constant 0 : index
    %14 = vector.load %arg5[%c8, %c0_19] : memref<24x1xf32, #tpu.memory_space<vmem>>, vector<8x1xf32>
    %c16 = arith.constant 16 : index
    %c0_20 = arith.constant 0 : index
    %15 = vector.load %arg5[%c16, %c0_20] : memref<24x1xf32, #tpu.memory_space<vmem>>, vector<8x1xf32>
    %c17_i32 = arith.constant 17 : i32
    %16 = tpu.dynamic_rotate %11 by %c17_i32 dim 1 : vector<8x512xf32>, i32 -> vector<8x512xf32>
    %c0_21 = arith.constant 0 : index
    %c0_22 = arith.constant 0 : index
    %17 = vector.load %arg3[%c0_21, %c0_22] : memref<9x512xf32, #tpu.memory_space<vmem>>, vector<1x512xf32>
    %18 = vector.broadcast %17 : vector<1x512xf32> to vector<8x512xf32>
    %19 = arith.mulf %16, %18 : vector<8x512xf32>
    %c16_i32 = arith.constant 16 : i32
    %20 = tpu.dynamic_rotate %11 by %c16_i32 dim 1 : vector<8x512xf32>, i32 -> vector<8x512xf32>
    %c1 = arith.constant 1 : index
    %c0_23 = arith.constant 0 : index
    %21 = vector.load %arg3[%c1, %c0_23] : memref<9x512xf32, #tpu.memory_space<vmem>>, vector<1x512xf32>
    %22 = vector.broadcast %21 : vector<1x512xf32> to vector<8x512xf32>
    %23 = arith.mulf %20, %22 : vector<8x512xf32>
    %c15_i32 = arith.constant 15 : i32
    %24 = tpu.dynamic_rotate %11 by %c15_i32 dim 1 : vector<8x512xf32>, i32 -> vector<8x512xf32>
    %c2 = arith.constant 2 : index
    %c0_24 = arith.constant 0 : index
    %25 = vector.load %arg3[%c2, %c0_24] : memref<9x512xf32, #tpu.memory_space<vmem>>, vector<1x512xf32>
    %26 = vector.broadcast %25 : vector<1x512xf32> to vector<8x512xf32>
    %27 = arith.mulf %24, %26 : vector<8x512xf32>
    %c1_i32 = arith.constant 1 : i32
    %28 = tpu.dynamic_rotate %11 by %c1_i32 dim 1 : vector<8x512xf32>, i32 -> vector<8x512xf32>
    %c3 = arith.constant 3 : index
    %c0_25 = arith.constant 0 : index
    %29 = vector.load %arg3[%c3, %c0_25] : memref<9x512xf32, #tpu.memory_space<vmem>>, vector<1x512xf32>
    %30 = vector.broadcast %29 : vector<1x512xf32> to vector<8x512xf32>
    %31 = arith.mulf %28, %30 : vector<8x512xf32>
    %c511_i32 = arith.constant 511 : i32
    %32 = tpu.dynamic_rotate %11 by %c511_i32 dim 1 : vector<8x512xf32>, i32 -> vector<8x512xf32>
    %c5 = arith.constant 5 : index
    %c0_26 = arith.constant 0 : index
    %33 = vector.load %arg3[%c5, %c0_26] : memref<9x512xf32, #tpu.memory_space<vmem>>, vector<1x512xf32>
    %34 = vector.broadcast %33 : vector<1x512xf32> to vector<8x512xf32>
    %35 = arith.mulf %32, %34 : vector<8x512xf32>
    %c497_i32 = arith.constant 497 : i32
    %36 = tpu.dynamic_rotate %11 by %c497_i32 dim 1 : vector<8x512xf32>, i32 -> vector<8x512xf32>
    %c6 = arith.constant 6 : index
    %c0_27 = arith.constant 0 : index
    %37 = vector.load %arg3[%c6, %c0_27] : memref<9x512xf32, #tpu.memory_space<vmem>>, vector<1x512xf32>
    %38 = vector.broadcast %37 : vector<1x512xf32> to vector<8x512xf32>
    %39 = arith.mulf %36, %38 : vector<8x512xf32>
    %c496_i32 = arith.constant 496 : i32
    %40 = tpu.dynamic_rotate %11 by %c496_i32 dim 1 : vector<8x512xf32>, i32 -> vector<8x512xf32>
    %c7 = arith.constant 7 : index
    %c0_28 = arith.constant 0 : index
    %41 = vector.load %arg3[%c7, %c0_28] : memref<9x512xf32, #tpu.memory_space<vmem>>, vector<1x512xf32>
    %42 = vector.broadcast %41 : vector<1x512xf32> to vector<8x512xf32>
    %43 = arith.mulf %40, %42 : vector<8x512xf32>
    %c495_i32 = arith.constant 495 : i32
    %44 = tpu.dynamic_rotate %11 by %c495_i32 dim 1 : vector<8x512xf32>, i32 -> vector<8x512xf32>
    %c8_29 = arith.constant 8 : index
    %c0_30 = arith.constant 0 : index
    %45 = vector.load %arg3[%c8_29, %c0_30] : memref<9x512xf32, #tpu.memory_space<vmem>>, vector<1x512xf32>
    %46 = vector.broadcast %45 : vector<1x512xf32> to vector<8x512xf32>
    %47 = arith.mulf %44, %46 : vector<8x512xf32>
    %48 = tpu.concatenate %19, %23, %27, %31, %11, %35, %39, %43, %47 in 0 : vector<8x512xf32>, vector<8x512xf32>, vector<8x512xf32>, vector<8x512xf32>, vector<8x512xf32>, vector<8x512xf32>, vector<8x512xf32>, vector<8x512xf32>, vector<8x512xf32> -> vector<72x512xf32>
    %49 = arith.truncf %48 : vector<72x512xf32> to vector<72x512xbf16>
    %cst_31 = arith.constant dense<0.000000e+00> : vector<8x512xf32>
    %50 = tpu.matmul %12, %49, %cst_31 {dimension_numbers = #tpu.dot_dimension_numbers<[1], [0], [0], [1], [0, 0, 1, 1], [], []>} : vector<8x72xbf16>, vector<72x512xbf16>, vector<8x512xf32> -> vector<8x512xf32>
    %51 = vector.broadcast %13 : vector<8x1xf32> to vector<8x512xf32>
    %52 = arith.addf %50, %51 : vector<8x512xf32>
    %cst_32 = arith.constant dense<0.000000e+00> : vector<8xf32>
    %53 = vector.multi_reduction <add>, %52, %cst_32 [1] : vector<8x512xf32> to vector<8xf32>
    %54 = vector.shape_cast %53 : vector<8xf32> to vector<8x1xf32>
    %cst_33 = arith.constant 0.001953125 : f32
    %55 = vector.broadcast %cst_33 : f32 to vector<8x1xf32>
    %56 = arith.mulf %54, %55 : vector<8x1xf32>
    %57 = vector.broadcast %56 : vector<8x1xf32> to vector<8x512xf32>
    %58 = arith.subf %52, %57 : vector<8x512xf32>
    %59 = arith.mulf %58, %58 : vector<8x512xf32>
    %cst_34 = arith.constant dense<0.000000e+00> : vector<8xf32>
    %60 = vector.multi_reduction <add>, %59, %cst_34 [1] : vector<8x512xf32> to vector<8xf32>
    %61 = vector.shape_cast %60 : vector<8xf32> to vector<8x1xf32>
    %cst_35 = arith.constant 0.001953125 : f32
    %62 = vector.broadcast %cst_35 : f32 to vector<8x1xf32>
    %63 = arith.mulf %61, %62 : vector<8x1xf32>
    %cst_36 = arith.constant 9.99999974E-6 : f32
    %64 = vector.broadcast %cst_36 : f32 to vector<8x1xf32>
    %65 = arith.addf %63, %64 : vector<8x1xf32>
    %66 = math.rsqrt %65 : vector<8x1xf32>
    %67 = arith.mulf %14, %66 : vector<8x1xf32>
    %68 = vector.broadcast %67 : vector<8x1xf32> to vector<8x512xf32>
    %69 = arith.mulf %58, %68 : vector<8x512xf32>
    %70 = vector.broadcast %15 : vector<8x1xf32> to vector<8x512xf32>
    %71 = arith.addf %69, %70 : vector<8x512xf32>
    %cst_37 = arith.constant 0.000000e+00 : f32
    %72 = vector.broadcast %cst_37 : f32 to vector<8x512xf32>
    %73 = arith.maximumf %71, %72 : vector<8x512xf32>
    %c0_38 = arith.constant 0 : index
    %c0_39 = arith.constant 0 : index
    %74 = vector.load %arg6[%c0_38, %c0_39] : memref<4x72xbf16, #tpu.memory_space<vmem>>, vector<4x72xbf16>
    %c0_40 = arith.constant 0 : index
    %c0_41 = arith.constant 0 : index
    %75 = vector.load %arg7[%c0_40, %c0_41] : memref<12x1xf32, #tpu.memory_space<vmem>>, vector<4x1xf32>
    %c4_42 = arith.constant 4 : index
    %c0_43 = arith.constant 0 : index
    %76 = vector.load %arg7[%c4_42, %c0_43] : memref<12x1xf32, #tpu.memory_space<vmem>>, vector<4x1xf32>
    %c8_44 = arith.constant 8 : index
    %c0_45 = arith.constant 0 : index
    %77 = vector.load %arg7[%c8_44, %c0_45] : memref<12x1xf32, #tpu.memory_space<vmem>>, vector<4x1xf32>
    %c17_i32_46 = arith.constant 17 : i32
    %78 = tpu.dynamic_rotate %73 by %c17_i32_46 dim 1 : vector<8x512xf32>, i32 -> vector<8x512xf32>
    %c0_47 = arith.constant 0 : index
    %c0_48 = arith.constant 0 : index
    %79 = vector.load %arg3[%c0_47, %c0_48] : memref<9x512xf32, #tpu.memory_space<vmem>>, vector<1x512xf32>
    %80 = vector.broadcast %79 : vector<1x512xf32> to vector<8x512xf32>
    %81 = arith.mulf %78, %80 : vector<8x512xf32>
    %c16_i32_49 = arith.constant 16 : i32
    %82 = tpu.dynamic_rotate %73 by %c16_i32_49 dim 1 : vector<8x512xf32>, i32 -> vector<8x512xf32>
    %c1_50 = arith.constant 1 : index
    %c0_51 = arith.constant 0 : index
    %83 = vector.load %arg3[%c1_50, %c0_51] : memref<9x512xf32, #tpu.memory_space<vmem>>, vector<1x512xf32>
    %84 = vector.broadcast %83 : vector<1x512xf32> to vector<8x512xf32>
    %85 = arith.mulf %82, %84 : vector<8x512xf32>
    %c15_i32_52 = arith.constant 15 : i32
    %86 = tpu.dynamic_rotate %73 by %c15_i32_52 dim 1 : vector<8x512xf32>, i32 -> vector<8x512xf32>
    %c2_53 = arith.constant 2 : index
    %c0_54 = arith.constant 0 : index
    %87 = vector.load %arg3[%c2_53, %c0_54] : memref<9x512xf32, #tpu.memory_space<vmem>>, vector<1x512xf32>
    %88 = vector.broadcast %87 : vector<1x512xf32> to vector<8x512xf32>
    %89 = arith.mulf %86, %88 : vector<8x512xf32>
    %c1_i32_55 = arith.constant 1 : i32
    %90 = tpu.dynamic_rotate %73 by %c1_i32_55 dim 1 : vector<8x512xf32>, i32 -> vector<8x512xf32>
    %c3_56 = arith.constant 3 : index
    %c0_57 = arith.constant 0 : index
    %91 = vector.load %arg3[%c3_56, %c0_57] : memref<9x512xf32, #tpu.memory_space<vmem>>, vector<1x512xf32>
    %92 = vector.broadcast %91 : vector<1x512xf32> to vector<8x512xf32>
    %93 = arith.mulf %90, %92 : vector<8x512xf32>
    %c511_i32_58 = arith.constant 511 : i32
    %94 = tpu.dynamic_rotate %73 by %c511_i32_58 dim 1 : vector<8x512xf32>, i32 -> vector<8x512xf32>
    %c5_59 = arith.constant 5 : index
    %c0_60 = arith.constant 0 : index
    %95 = vector.load %arg3[%c5_59, %c0_60] : memref<9x512xf32, #tpu.memory_space<vmem>>, vector<1x512xf32>
    %96 = vector.broadcast %95 : vector<1x512xf32> to vector<8x512xf32>
    %97 = arith.mulf %94, %96 : vector<8x512xf32>
    %c497_i32_61 = arith.constant 497 : i32
    %98 = tpu.dynamic_rotate %73 by %c497_i32_61 dim 1 : vector<8x512xf32>, i32 -> vector<8x512xf32>
    %c6_62 = arith.constant 6 : index
    %c0_63 = arith.constant 0 : index
    %99 = vector.load %arg3[%c6_62, %c0_63] : memref<9x512xf32, #tpu.memory_space<vmem>>, vector<1x512xf32>
    %100 = vector.broadcast %99 : vector<1x512xf32> to vector<8x512xf32>
    %101 = arith.mulf %98, %100 : vector<8x512xf32>
    %c496_i32_64 = arith.constant 496 : i32
    %102 = tpu.dynamic_rotate %73 by %c496_i32_64 dim 1 : vector<8x512xf32>, i32 -> vector<8x512xf32>
    %c7_65 = arith.constant 7 : index
    %c0_66 = arith.constant 0 : index
    %103 = vector.load %arg3[%c7_65, %c0_66] : memref<9x512xf32, #tpu.memory_space<vmem>>, vector<1x512xf32>
    %104 = vector.broadcast %103 : vector<1x512xf32> to vector<8x512xf32>
    %105 = arith.mulf %102, %104 : vector<8x512xf32>
    %c495_i32_67 = arith.constant 495 : i32
    %106 = tpu.dynamic_rotate %73 by %c495_i32_67 dim 1 : vector<8x512xf32>, i32 -> vector<8x512xf32>
    %c8_68 = arith.constant 8 : index
    %c0_69 = arith.constant 0 : index
    %107 = vector.load %arg3[%c8_68, %c0_69] : memref<9x512xf32, #tpu.memory_space<vmem>>, vector<1x512xf32>
    %108 = vector.broadcast %107 : vector<1x512xf32> to vector<8x512xf32>
    %109 = arith.mulf %106, %108 : vector<8x512xf32>
    %110 = tpu.concatenate %81, %85, %89, %93, %73, %97, %101, %105, %109 in 0 : vector<8x512xf32>, vector<8x512xf32>, vector<8x512xf32>, vector<8x512xf32>, vector<8x512xf32>, vector<8x512xf32>, vector<8x512xf32>, vector<8x512xf32>, vector<8x512xf32> -> vector<72x512xf32>
    %111 = arith.truncf %110 : vector<72x512xf32> to vector<72x512xbf16>
    %cst_70 = arith.constant dense<0.000000e+00> : vector<4x512xf32>
    %112 = tpu.matmul %74, %111, %cst_70 {dimension_numbers = #tpu.dot_dimension_numbers<[1], [0], [0], [1], [0, 0, 1, 1], [], []>} : vector<4x72xbf16>, vector<72x512xbf16>, vector<4x512xf32> -> vector<4x512xf32>
    %113 = vector.broadcast %75 : vector<4x1xf32> to vector<4x512xf32>
    %114 = arith.addf %112, %113 : vector<4x512xf32>
    %cst_71 = arith.constant dense<0.000000e+00> : vector<4xf32>
    %115 = vector.multi_reduction <add>, %114, %cst_71 [1] : vector<4x512xf32> to vector<4xf32>
    %116 = vector.shape_cast %115 : vector<4xf32> to vector<4x1xf32>
    %cst_72 = arith.constant 0.001953125 : f32
    %117 = vector.broadcast %cst_72 : f32 to vector<4x1xf32>
    %118 = arith.mulf %116, %117 : vector<4x1xf32>
    %119 = vector.broadcast %118 : vector<4x1xf32> to vector<4x512xf32>
    %120 = arith.subf %114, %119 : vector<4x512xf32>
    %121 = arith.mulf %120, %120 : vector<4x512xf32>
    %cst_73 = arith.constant dense<0.000000e+00> : vector<4xf32>
    %122 = vector.multi_reduction <add>, %121, %cst_73 [1] : vector<4x512xf32> to vector<4xf32>
    %123 = vector.shape_cast %122 : vector<4xf32> to vector<4x1xf32>
    %cst_74 = arith.constant 0.001953125 : f32
    %124 = vector.broadcast %cst_74 : f32 to vector<4x1xf32>
    %125 = arith.mulf %123, %124 : vector<4x1xf32>
    %cst_75 = arith.constant 9.99999974E-6 : f32
    %126 = vector.broadcast %cst_75 : f32 to vector<4x1xf32>
    %127 = arith.addf %125, %126 : vector<4x1xf32>
    %128 = math.rsqrt %127 : vector<4x1xf32>
    %129 = arith.mulf %76, %128 : vector<4x1xf32>
    %130 = vector.broadcast %129 : vector<4x1xf32> to vector<4x512xf32>
    %131 = arith.mulf %120, %130 : vector<4x512xf32>
    %132 = vector.broadcast %77 : vector<4x1xf32> to vector<4x512xf32>
    %133 = arith.addf %131, %132 : vector<4x512xf32>
    %cst_76 = arith.constant 0.000000e+00 : f32
    %134 = vector.broadcast %cst_76 : f32 to vector<4x512xf32>
    %135 = arith.maximumf %133, %134 : vector<4x512xf32>
    %136 = vector.extract_strided_slice %135 {offsets = [0, 0], sizes = [4, 256], strides = [1, 1]} : vector<4x512xf32> to vector<4x256xf32>
    %c0_77 = arith.constant 0 : index
    %c0_78 = arith.constant 0 : index
    %137 = vector.load %arg8[%c0_77, %c0_78] : memref<8x256xf32, #tpu.memory_space<vmem>>, vector<4x256xf32>
    tpu.vector_store %arg8[%c0_77, %c0_78], %136 {strides = array<i32>} : memref<8x256xf32, #tpu.memory_space<vmem>>, vector<4x256xf32>,
    %138 = vector.extract_strided_slice %135 {offsets = [0, 256], sizes = [4, 256], strides = [1, 1]} : vector<4x512xf32> to vector<4x256xf32>
    %c4_79 = arith.constant 4 : index
    %c0_80 = arith.constant 0 : index
    %139 = vector.load %arg8[%c4_79, %c0_80] : memref<8x256xf32, #tpu.memory_space<vmem>>, vector<4x256xf32>
    tpu.vector_store %arg8[%c4_79, %c0_80], %138 {strides = array<i32>} : memref<8x256xf32, #tpu.memory_space<vmem>>, vector<4x256xf32>,
    return
  }
}

</mosaic_0001>

<bundles_post_ra>
// kernel: expansive_layer_forward.1
= control target key start
LH: loop header
LB: loop body
LE: loop exit
PB: predicated region body
PF: predicated region fallthrough
CT: control target
= control target key end

     0   :  { %v997_v3 = vmov 0.0   ;;  %vm47_vm0 = vcmask 523264   ;;  %s998_s23 = smov 113   ;;  %s999_s24 = smov 111   ;;  %v1006_v32 = vmov 0   ;;  %v162_v34 = vlaneseq  ;;  %s1755_s2 = inlined_call_operand.vmem [shape: f32[64,256], index: 2, kind: input, shape index: {}]   ;;  %s1756_s1 = inlined_call_operand.vmem [shape: f32[8,64], index: 1, kind: input, shape index: {}]   ;;  %s1757_s0 = inlined_call_operand.vmem [shape: f32[8,256], index: 0, kind: input, shape index: {}]   ;;  %s1758_s5 = inlined_call_operand.vmem [shape: f32[24,1], index: 5, kind: input, shape index: {}]   ;;  %s1759_s3 = inlined_call_operand.vmem [shape: f32[9,512], index: 3, kind: input, shape index: {}]   ;;  %s1760_s4 = inlined_call_operand.vmem [shape: bf16[8,72], index: 4, kind: input, shape index: {}]   ;;  %s1761_s7 = inlined_call_operand.vmem [shape: f32[12,1], index: 7, kind: input, shape index: {}]   ;;  %s1762_s6 = inlined_call_operand.vmem [shape: bf16[4,72], index: 6, kind: input, shape index: {}]   ;;  %s1763_s8 = inlined_call_operand.vmem [shape: f32[8,256], index: 8, kind: output, shape index: {}]  }
   0x1   :  { %v46_v0 = vld [vmem:[%s1755_s2 + $0x78] sm:$0xff]  ;;  %v45_v1 = vld [vmem:[%s1755_s2 + $0x70] sm:$0xff]  ;;  %v44_v2 = vld [vmem:[%s1755_s2 + $0x68] sm:$0xff]  ;;  %115 = vmatprep.mubr.f32.mxu0 %v997_v3  ;;  %s1001_s25 = smov 127   ;;  %s1002_s26 = smov 15   ;;  %549 = vmatprep.mubr.bf16.mxu1 %v1006_v32  ;;  %vm504_vm2 = vcmask 1043456  }
   0x2   :  { %67 = vmatprep.subr.mxu0 %v46_v0  ;;  %v43_v4 = vld [vmem:[%s1755_s2 + $0x60] sm:$0xff]  ;;  %v42_v5 = vld [vmem:[%s1755_s2 + $0x58] sm:$0xff]  ;;  %v41_v6 = vld [vmem:[%s1755_s2 + $0x50] sm:$0xff]  ;;  %s1003_s27 = smov 1   ;;  %s1004_s28 = smov 17   ;;  %991 = vset.pattern.permute.xlu0 %v1006_v32  ;;  %v1198_v37 = vshrl.u32 %v162_v34, 7 }
   0x3   :  { %68 = vmatpush1.msra.mxu0 %v45_v1  ;;  %v40_v7 = vld [vmem:[%s1755_s2 + $0x48] sm:$0xff]  ;;  %v39_v8 = vld [vmem:[%s1755_s2 + $0x40] sm:$0xff]  ;;  %v38_v9 = vld [vmem:[%s1755_s2 + $0x38] sm:$0xff]  ;;  %s1005_s29 = smov 16   ;;  %992 = vset.pattern.permute.xlu1 %v1006_v32  ;;  %v1204_v40 = vand.u32 127, %v162_v34  ;;  %vm500_vm10 = vcmask 588800  }
   0x4   :  { %69 = vmatprep.subr.mxu0 %v44_v2  ;;  %v37_v10 = vld [vmem:[%s1755_s2 + $0x30] sm:$0xff]  ;;  %v36_v11 = vld [vmem:[%s1755_s2 + $0x28] sm:$0xff]  ;;  %v35_v12 = vld [vmem:[%s1755_s2 + $0x20] sm:$0xff]  ;;  %v1207_v41 = vsub.s32 2, %v1198_v37  ;;  %v1210_v42 = vsub.s32 3, %v1198_v37 }
   0x5   :  { %70 = vmatpush1.msra.mxu0 %v43_v4  ;;  %v34_v13 = vld [vmem:[%s1755_s2 + $0x18] sm:$0xff]  ;;  %v33_v14 = vld [vmem:[%s1755_s2 + $0x10] sm:$0xff]  ;;  %v32_v15 = vld [vmem:[%s1755_s2 + $0x8] sm:$0xff]  ;;  %vm443_vm1 = vcmp.lt.s32.totalorder %v1204_v40, 111  ;;  %vm403_vm3 = vcmp.lt.s32.totalorder %v1204_v40, 112  ;;  %vm363_vm4 = vcmp.lt.s32.totalorder %v1204_v40, 113 }
   0x6   :  { %71 = vmatprep.subr.mxu0 %v42_v5  ;;  %v31_v16 = vld [vmem:[%s1755_s2] sm:$0xff]  ;;  %v135_v20 = vld [vmem:[%s1757_s0 + $0x8] sm:$0xf0]  ;;  %v123_v23 = vld [vmem:[%s1757_s0 + $0x8] sm:$0xf]  ;;  %vm323_vm5 = vcmp.lt.s32.totalorder %v1204_v40, 127 }
   0x7   :  { %72 = vmatpush1.msra.mxu0 %v41_v6  ;;  %v30_v17 = vld [vmem:[%s1756_s1] sm:$0xff]  ;;  %v139_v21 = vrot.slane %v135_v20, 4  ;;  %125 = vst [vmem:[#allocation2] sm:$0xf] %v123_v23  ;;  %vm243_vm6 = vcmp.lt.s32.totalorder %v1204_v40, 15  ;;  %vm283_vm7 = vcmp.lt.s32.totalorder %v1204_v40, 1 }
   0x8   :  { %73 = vmatprep.subr.mxu0 %v40_v7  ;;  %v134_v18 = vld [vmem:[%s1757_s0] sm:$0xf0]  ;;  %v122_v22 = vld [vmem:[%s1757_s0] sm:$0xf]  ;;  %s1000_s0 = smov 112   ;;  %vm203_vm8 = vcmp.lt.s32.totalorder %v1204_v40, 16 }
   0x9   :  { %74 = vmatpush1.msra.mxu0 %v39_v8  ;;  %v138_v19 = vrot.slane %v134_v18, 4  ;;  %143 = vst [vmem:[#allocation2 + $0x8] sm:$0xf] %v139_v21  ;;  %124 = vst [vmem:[#allocation2 + $0x10] sm:$0xf] %v122_v22  ;;  %v151_v33 = vld [vmem:[%s1758_s5] sm:$0xff] }
   0xa   :  { %75 = vmatprep.subr.mxu0 %v38_v9  ;;  %v1215_v43 = vld [vmem:[%s1759_s3 + $0x20] ss:$8 sm:$0xf]  ;;  %v1243_v54 = vld [vmem:[%s1759_s3 + $0x7] ss:$8 sm:$0xf] }
   0xb   :  { %76 = vmatpush1.msra.mxu0 %v37_v10  ;;  %142 = vst [vmem:[#allocation2 + $0x18] sm:$0xf] %v138_v19  ;;  %v1224_v46 = vrot.slane %v1215_v43, %v1207_v41  ;;  %v1228_v47 = vrot.slane %v1215_v43, %v1210_v42  ;;  %v1248_v55 = vld [vmem:[%s1759_s3 + $0x6] ss:$8 sm:$0xf]  ;;  %v1257_v60 = vrot.slane %v1243_v54, %v1207_v41  ;;  %vm164_vm9 = vcmp.lt.s32.totalorder %v1204_v40, 17 }
   0xc   :  { %77 = vmatprep.subr.mxu0 %v36_v11  ;;  %v1261_v61 = vrot.slane %v1243_v54, %v1210_v42  ;;  %v1268_v63 = vrot.slane %v1248_v55, %v1207_v41  ;;  %v1272_v0 = vrot.slane %v1248_v55, %v1210_v42  ;;  %v1304_v18 = vld [vmem:[%s1759_s3 + $0x2] ss:$8 sm:$0xf]  ;;  %v1316_v21 = vld [vmem:[%s1759_s3 + $0x3] ss:$8 sm:$0xf] }
   0xd   :  { %78 = vmatpush1.msra.mxu0 %v35_v12  ;;  %v1336_v34 = vrot.slane %v1316_v21, %v1210_v42 }
   0xe   :  { %79 = vmatprep.subr.mxu0 %v34_v13 }
   0xf   :  { %80 = vmatpush1.msra.mxu0 %v33_v14 }
  0x10   :  { %81 = vmatprep.subr.mxu0 %v32_v15  ;;  %v969_v15 = vld [vmem:[%s1759_s3 + $0x5] ss:$8 sm:$0xf] }
  0x11   :  { %82 = vmatpush1.msra.mxu0 %v31_v16  ;;  %v1308_v19 = vrot.slane %v969_v15, %v1207_v41  ;;  %v1311_v20 = vrot.slane %v969_v15, %v1210_v42 }
  0x12   :  { %965 = vmatmul.mubr.msk.f32.vlgmr.msra.gmra.mxu0 %vm47_vm0, %v30_v17 }
  0x13   :  { %590 = vmatprep.mubr.bf16.mxu0 %v1006_v32 }
  0xd2   :  { %v117_v24 = vpop.f32.mrf.mxu0 }
  0xd3   :  { %v128_v25 = vrot.slane %v117_v24, 4  ;;  %144 = vst [vmem:[#allocation2 + $0x18] sm:$0xf0] %v117_v24  ;;  %v1323_v24 = vrot.slane %v1304_v18, %v1210_v42 }
  0xd4   :  { %v119_v26 = vpop.f32.mrf.mxu0 }
  0xd5   :  { %132 = vst [vmem:[#allocation2 + $0x10] sm:$0xf0] %v128_v25  ;;  %v129_v27 = vrot.slane %v119_v26, 4  ;;  %145 = vst [vmem:[#allocation2 + $0x8] sm:$0xf0] %v119_v26 }
  0xd7   :  { %133 = vst [vmem:[#allocation2] sm:$0xf0] %v129_v27 }
  0xda   :  { %v1115_v28 = vld [vmem:[#allocation2 + $0x18] sm:$0xff] }
  0xdb   :  { %359 = vrot.lane.b32.xlu0 %v1115_v28, %s998_s23  ;;  %439 = vrot.lane.b32.xlu1 %v1115_v28, %s999_s24 }
  0xdc   :  { %v1129_v29 = vld [vmem:[#allocation2 + $0x8] sm:$0xff]  ;;  %v1131_v30 = vld [vmem:[#allocation2 + $0x10] sm:$0xff] }
  0xde   :  { %v1161_v31 = vld [vmem:[#allocation2] sm:$0xff] }
  0xdf   :  { %399 = vrot.lane.b32.xlu0 %v1115_v28, %s1000_s0  ;;  %319 = vrot.lane.b32.xlu1 %v1115_v28, %s1001_s25 }
  0xe3   :  { %239 = vrot.lane.b32.xlu0 %v1115_v28, %s1002_s26  ;;  %279 = vrot.lane.b32.xlu1 %v1115_v28, %s1003_s27 }
  0xe7   :  { %441 = vrot.lane.b32.xlu1 %v1129_v29, %s999_s24  ;;  %435 = vrot.lane.b32.xlu0 %v1131_v30, %s999_s24 }
  0xeb   :  { %395 = vrot.lane.b32.xlu1 %v1131_v30, %s1000_s0  ;;  %355 = vrot.lane.b32.xlu0 %v1131_v30, %s998_s23 }
  0xef   :  { %401 = vrot.lane.b32.xlu1 %v1129_v29, %s1000_s0  ;;  %361 = vrot.lane.b32.xlu0 %v1129_v29, %s998_s23 }
  0xf3   :  { %235 = vrot.lane.b32.xlu1 %v1131_v30, %s1002_s26  ;;  %315 = vrot.lane.b32.xlu0 %v1131_v30, %s1001_s25 }
  0xf7   :  { %275 = vrot.lane.b32.xlu1 %v1131_v30, %s1003_s27  ;;  %241 = vrot.lane.b32.xlu0 %v1129_v29, %s1002_s26 }
  0xfb   :  { %321 = vrot.lane.b32.xlu1 %v1129_v29, %s1001_s25  ;;  %154 = vrot.lane.b32.xlu0 %v1131_v30, %s1004_s28 }
  0xff   :  { %281 = vrot.lane.b32.xlu1 %v1129_v29, %s1003_s27  ;;  %195 = vrot.lane.b32.xlu0 %v1131_v30, %s1005_s29 }
 0x103   :  { %357 = vrot.lane.b32.xlu1 %v1161_v31, %s998_s23  ;;  %437 = vrot.lane.b32.xlu0 %v1161_v31, %s999_s24 }
 0x107   :  { %397 = vrot.lane.b32.xlu1 %v1161_v31, %s1000_s0  ;;  %317 = vrot.lane.b32.xlu0 %v1161_v31, %s1001_s25 }
 0x10b   :  { %201 = vrot.lane.b32.xlu1 %v1129_v29, %s1005_s29  ;;  %237 = vrot.lane.b32.xlu0 %v1161_v31, %s1002_s26 }
 0x10f   :  { %156 = vrot.lane.b32.xlu1 %v1161_v31, %s1004_s28  ;;  %277 = vrot.lane.b32.xlu0 %v1161_v31, %s1003_s27 }
 0x113   :  { %197 = vrot.lane.b32.xlu1 %v1161_v31, %s1005_s29  ;;  %160 = vrot.lane.b32.xlu0 %v1129_v29, %s1004_s28 }
 0x117   :  { %199 = vrot.lane.b32.xlu1 %v1115_v28, %s1005_s29  ;;  %158 = vrot.lane.b32.xlu0 %v1115_v28, %s1004_s28 }
 0x11b   :  { %497 = vperm.xlu0 %991, %v151_v33  }
 0x14d   :  { %v1194_v35 = vpop.permute.xlu0 %359  ;;  %v1196_v36 = vpop.permute.xlu1 %439 }
 0x151   :  { %v1200_v38 = vpop.permute.xlu0 %399  ;;  %v1202_v39 = vpop.permute.xlu1 %319 }
 0x155   :  { %v1217_v44 = vpop.permute.xlu0 %239  ;;  %v1219_v45 = vpop.permute.xlu1 %279 }
 0x159   :  { %v442_v48 = vpop.permute.xlu1 %441  ;;  %v1230_v49 = vpop.permute.xlu0 %435 }
 0x15a   :  { %v444_v50 = vsel %vm443_vm1, %v1196_v36, %v442_v48  ;;  %v447_v51 = vsel %vm443_vm1, %v442_v48, %v1230_v49  ;;  %v1339_v48 = vsub.s32 1, %v1198_v37 }
 0x15b   :  { %v473_v52 = vmul.f32 %v1224_v46, %v444_v50  ;;  %v474_v53 = vmul.f32 %v1228_v47, %v447_v51  ;;  %v1346_v51 = vsub.s32 0, %v1198_v37 }
 0x15d   :  { %v493_v56 = vpack.c.bf16 %v473_v52, %v473_v52  ;;  %v494_v57 = vpack.c.bf16 %v474_v53, %v474_v53  ;;  %v1250_v58 = vpop.permute.xlu1 %395  ;;  %v1252_v59 = vpop.permute.xlu0 %355  ;;  %v1359_v37 = vrot.slane %v1215_v43, %v1346_v51 }
 0x15f   :  { %975 = vmatprep.subr.msk.bf16.mxu0 %vm504_vm2, %v494_v57  ;;  %v512_v62 = vsel %vm504_vm2, %v493_v56, 0 }
 0x160   :  { %565 = vmatpush1.bf16.msra.mxu0 %v512_v62 }
 0x161   :  { %v402_v1 = vpop.permute.xlu1 %401  ;;  %v362_v2 = vpop.permute.xlu0 %361 }
 0x162   :  { %v404_v3 = vsel %vm403_vm3, %v1200_v38, %v402_v1  ;;  %v407_v4 = vsel %vm403_vm3, %v402_v1, %v1250_v58  ;;  %v364_v5 = vsel %vm363_vm4, %v1194_v35, %v362_v2  ;;  %v367_v6 = vsel %vm363_vm4, %v362_v2, %v1252_v59 }
 0x163   :  { %v433_v7 = vmul.f32 %v1257_v60, %v404_v3  ;;  %v434_v8 = vmul.f32 %v1261_v61, %v407_v4  ;;  %v393_v9 = vmul.f32 %v1268_v63, %v364_v5  ;;  %v394_v10 = vmul.f32 %v1272_v0, %v367_v6 }
 0x164   :  { %v1371_v6 = vrot.slane %v1248_v55, %v1339_v48 }
 0x165   :  { %v489_v11 = vpack.c.bf16 %v433_v7, %v393_v9  ;;  %v1290_v12 = vpop.permute.xlu1 %235  ;;  %v1292_v13 = vpop.permute.xlu0 %315  ;;  %v490_v14 = vpack.c.bf16 %v434_v8, %v394_v10  ;;  %v1381_v8 = vrot.slane %v1243_v54, %v1346_v51 }
 0x167   :  { %566 = vmatprep.subr.bf16.mxu0 %v490_v14 }
 0x168   :  { %567 = vmatpush1.bf16.msra.mxu0 %v489_v11  ;;  %v1396_v11 = vrot.slane %v969_v15, %v1339_v48 }
 0x169   :  { %v1297_v16 = vpop.permute.xlu1 %275  ;;  %v1299_v17 = vpop.permute.xlu0 %241 }
 0x16a   :  { %v244_v50 = vsel %vm243_vm6, %v1217_v44, %v1299_v17 }
 0x16b   :  { %v274_v1 = vmul.f32 %v1323_v24, %v244_v50 }
 0x16d   :  { %v322_v22 = vpop.permute.xlu1 %321  ;;  %v1319_v23 = vpop.permute.xlu0 %154 }
 0x16e   :  { %v324_v25 = vsel %vm323_vm5, %v1202_v39, %v322_v22  ;;  %v327_v26 = vsel %vm323_vm5, %v322_v22, %v1292_v13  ;;  %v1399_v22 = vrot.slane %v969_v15, %v1346_v51 }
 0x16f   :  { %v353_v27 = vmul.f32 %v1308_v19, %v324_v25  ;;  %v354_v33 = vmul.f32 %v1311_v20, %v327_v26 }
 0x171   :  { %v485_v52 = vpack.c.bf16 %v353_v27, %v1115_v28  ;;  %v282_v53 = vpop.permute.xlu1 %281  ;;  %v1349_v56 = vpop.permute.xlu0 %195  ;;  %v486_v57 = vpack.c.bf16 %v354_v33, %v1129_v29  ;;  %v1363_v28 = vrot.slane %v1215_v43, %v1339_v48  ;;  %v1367_v29 = vrot.slane %v1248_v55, %v1346_v51 }
 0x172   :  { %v284_v62 = vsel %vm283_vm7, %v1219_v45, %v282_v53  ;;  %v1389_v55 = vrot.slane %v1243_v54, %v1339_v48 }
 0x173   :  { %v314_v2 = vmul.f32 %v1336_v34, %v284_v62  ;;  %568 = vmatprep.subr.bf16.mxu0 %v486_v57 }
 0x174   :  { %569 = vmatpush1.bf16.msra.mxu0 %v485_v52 }
 0x175   :  { %v358_v3 = vpop.permute.xlu1 %357  ;;  %v438_v4 = vpop.permute.xlu0 %437  ;;  %v482_v5 = vpack.c.bf16 %v314_v2, %v274_v1  ;;  %v1429_v1 = vrot.slane %v1316_v21, %v1346_v51 }
 0x176   :  { %v445_v7 = vsel %vm443_vm1, %v438_v4, %v1196_v36  ;;  %v446_v43 = vsel %vm443_vm1, %v1230_v49, %v438_v4  ;;  %v366_v9 = vsel %vm363_vm4, %v1252_v59, %v358_v3  ;;  %v365_v49 = vsel %vm363_vm4, %v358_v3, %v1194_v35 }
 0x177   :  { %v471_v10 = vmul.f32 %v1359_v37, %v446_v43  ;;  %570 = vmatprep.subr.bf16.mxu0 %v482_v5  ;;  %v472_v36 = vmul.f32 %v1363_v28, %v445_v7  ;;  %v391_v27 = vmul.f32 %v1367_v29, %v366_v9  ;;  %v392_v15 = vmul.f32 %v1371_v6, %v365_v49  ;;  %v169_v5 = vld [vmem:[%s1759_s3] ss:$8 sm:$0xf] }
 0x178   :  { %v287_v7 = vsel %vm283_vm7, %v282_v53, %v1297_v16  ;;  %v1453_v49 = vrot.slane %v1316_v21, %v1339_v48  ;;  %v1457_v53 = vrot.slane %v1316_v21, %v1207_v41 }
 0x179   :  { %v398_v14 = vpop.permute.xlu1 %397  ;;  %v318_v59 = vpop.permute.xlu0 %317  ;;  %v492_v25 = vpack.c.bf16 %v472_v36, %v472_v36  ;;  %v491_v26 = vpack.c.bf16 %v471_v10, %v471_v10  ;;  %v1444_v10 = vrot.slane %v1304_v18, %v1339_v48  ;;  %v1448_v36 = vrot.slane %v1304_v18, %v1207_v41 }
 0x17a   :  { %v405_v54 = vsel %vm403_vm3, %v398_v14, %v1200_v38  ;;  %v406_v35 = vsel %vm403_vm3, %v1250_v58, %v398_v14  ;;  %v325_v33 = vsel %vm323_vm5, %v318_v59, %v1202_v39  ;;  %v326_v57 = vsel %vm323_vm5, %v1292_v13, %v318_v59  ;;  %v966_v38 = vld [vmem:[%s1759_s3 + $0x1] ss:$8 sm:$0xf] }
 0x17b   :  { %v431_v50 = vmul.f32 %v1381_v8, %v406_v35  ;;  %v432_v52 = vmul.f32 %v1389_v55, %v405_v54  ;;  %973 = vmatprep.subr.msk.bf16.mxu1 %vm504_vm2, %v492_v25  ;;  %v1423_v58 = vrot.slane %v1304_v18, %v1346_v51  ;;  %v352_v39 = vmul.f32 %v1396_v11, %v325_v33 }
 0x17c   :  { %v506_v62 = vsel %vm504_vm2, %v491_v26, 0  ;;  %v351_v43 = vmul.f32 %v1399_v22, %v326_v57  ;;  %v1440_v9 = vrot.slane %v966_v38, %v1346_v51  ;;  %v1466_v59 = vrot.slane %v169_v5, %v1339_v48 }
 0x17d   :  { %524 = vmatpush1.bf16.msra.mxu1 %v506_v62  ;;  %v202_v13 = vpop.permute.xlu1 %201  ;;  %v238_v2 = vpop.permute.xlu0 %237  ;;  %v488_v3 = vpack.c.bf16 %v432_v52, %v392_v15  ;;  %v487_v4 = vpack.c.bf16 %v431_v50, %v391_v27  ;;  %v484_v25 = vpack.c.bf16 %v352_v39, %v1161_v31  ;;  %v247_v26 = vsel %vm243_vm6, %v1299_v17, %v1290_v12 }
 0x17e   :  { %v245_v14 = vsel %vm243_vm6, %v238_v2, %v1217_v44  ;;  %v246_v18 = vsel %vm243_vm6, %v1290_v12, %v238_v2  ;;  %v311_v21 = vmul.f32 %v1429_v1, %v287_v7  ;;  %v1475_v44 = vrot.slane %v966_v38, %v1339_v48 }
 0x17f   :  { %525 = vmatprep.subr.bf16.mxu1 %v488_v3  ;;  %v1478_v35 = vrot.slane %v169_v5, %v1346_v51  ;;  %v207_v31 = vsel %vm203_vm8, %v202_v13, %v1349_v56  ;;  %v483_v33 = vpack.c.bf16 %v351_v43, %v1131_v30  ;;  %v272_v48 = vmul.f32 %v1444_v10, %v246_v18 }
 0x180   :  { %v273_v51 = vmul.f32 %v1448_v36, %v245_v14  ;;  %v271_v52 = vmul.f32 %v1423_v58, %v247_v26  ;;  %v1499_v57 = vrot.slane %v966_v38, %v1207_v41  ;;  %v1505_v3 = vrot.slane %v169_v5, %v1207_v41 }
 0x181   :  { %526 = vmatpush1.bf16.msra.mxu1 %v487_v4  ;;  %v157_v27 = vpop.permute.xlu1 %156  ;;  %v278_v54 = vpop.permute.xlu0 %277  ;;  %v1508_v4 = vrot.slane %v169_v5, %v1210_v42  ;;  %v231_v7 = vmul.f32 %v1440_v9, %v207_v31 }
 0x182   :  { %527 = vmatprep.subr.bf16.mxu1 %v484_v25  ;;  %v285_v12 = vsel %vm283_vm7, %v278_v54, %v1219_v45  ;;  %v286_v17 = vsel %vm283_vm7, %v1297_v16, %v278_v54  ;;  %v167_v45 = vsel %vm164_vm9, %v1319_v23, %v157_v27  ;;  %v1502_v16 = vrot.slane %v966_v38, %v1210_v42 }
 0x183   :  { %v312_v15 = vmul.f32 %v1453_v49, %v286_v17  ;;  %v313_v50 = vmul.f32 %v1457_v53, %v285_v12  ;;  %v479_v14 = vpack.c.bf16 %v311_v21, %v271_v52  ;;  %v192_v18 = vmul.f32 %v1466_v59, %v167_v45 }
 0x185   :  { %v481_v30 = vpack.c.bf16 %v313_v50, %v273_v51  ;;  %528 = vmatpush1.bf16.msra.mxu1 %v483_v33  ;;  %v198_v39 = vpop.permute.xlu1 %197  ;;  %v161_v62 = vpop.permute.xlu0 %160  ;;  %v480_v2 = vpack.c.bf16 %v312_v15, %v272_v48 }
 0x186   :  { %v206_v43 = vsel %vm203_vm8, %v1349_v56, %v198_v39  ;;  %v168_v38 = vsel %vm164_vm9, %v161_v62, %v1319_v23 }
 0x187   :  { %v232_v25 = vmul.f32 %v1475_v44, %v206_v43  ;;  %v191_v41 = vmul.f32 %v1478_v35, %v168_v38  ;;  %529 = vmatprep.subr.bf16.mxu1 %v480_v2  ;;  %571 = vmatpush1.bf16.msra.mxu0 %v481_v30 }
 0x189   :  { %530 = vmatpush1.bf16.msra.mxu1 %v479_v14  ;;  %v200_v42 = vpop.permute.xlu1 %199  ;;  %v159_v5 = vpop.permute.xlu0 %158  ;;  %v476_v26 = vpack.c.bf16 %v232_v25, %v192_v18  ;;  %v475_v54 = vpack.c.bf16 %v231_v7, %v191_v41 }
 0x18a   :  { %v204_v56 = vsel %vm203_vm8, %v200_v42, %v202_v13  ;;  %v205_v23 = vsel %vm203_vm8, %v198_v39, %v200_v42  ;;  %v165_v21 = vsel %vm164_vm9, %v159_v5, %v161_v62  ;;  %v166_v31 = vsel %vm164_vm9, %v157_v27, %v159_v5  ;;  %v150_v13 = vld [vmem:[%s1760_s4] sm:$0xf] }
 0x18b   :  { %v233_v12 = vmul.f32 %v1499_v57, %v205_v23  ;;  %v234_v17 = vmul.f32 %v1502_v16, %v204_v56  ;;  %v193_v33 = vmul.f32 %v1505_v3, %v166_v31  ;;  %v194_v48 = vmul.f32 %v1508_v4, %v165_v21  ;;  %531 = vmatprep.subr.bf16.mxu1 %v476_v26 }
 0x18d   :  { %v477_v51 = vpack.c.bf16 %v233_v12, %v193_v33  ;;  %532 = vmatpush1.bf16.msra.mxu1 %v475_v54  ;;  %v478_v15 = vpack.c.bf16 %v234_v17, %v194_v48 }
 0x18f   :  { %572 = vmatprep.subr.bf16.mxu0 %v478_v15 }
 0x190   :  { %974 = vmatmul.mubr.msk.bf16.vlgmr.msra.gmra.mxu1 %vm500_vm10, %v150_v13  ;;  %573 = vmatpush1.bf16.msra.mxu0 %v477_v51 }
 0x191   :  { %848 = vmatprep.mubr.bf16.mxu1 %v1006_v32 }
 0x193   :  { %976 = vmatmul.mubr.msk.bf16.vlgmr.msra.gmra.mxu0 %vm500_vm10, %v150_v13  ;;  %v153_v13 = vld [vmem:[%s1758_s5 + $0x10] sm:$0xff] }
 0x194   :  { %889 = vmatprep.mubr.bf16.mxu0 %v1006_v32 }
 0x196   :  { %v498_v50 = vpop.permute.xlu0 %497 }
 0x250   :  { %v551_v27 = vpop.f32.mrf.mxu1 }
 0x251   :  { %v552_v45 = vadd.f32 %v551_v27, %v498_v50 }
 0x252   :  { %v553_v52 = vpop.f32.mrf.mxu1 }
 0x253   :  { %v554_v30 = vadd.f32 %v553_v52, %v498_v50  ;;  %v592_v39 = vpop.f32.mrf.mxu0  ;;  %v152_v52 = vld [vmem:[%s1758_s5 + $0x8] sm:$0xff] }
 0x254   :  { %v555_v62 = vpop.f32.mrf.mxu1  ;;  %v593_v2 = vadd.f32 %v592_v39, %v498_v50 }
 0x255   :  { %v599_v7 = vadd.f32 %v554_v30, %v552_v45  ;;  %v594_v43 = vpop.f32.mrf.mxu0 }
 0x256   :  { %v556_v38 = vpop.f32.mrf.mxu1  ;;  %v595_v14 = vadd.f32 %v594_v43, %v498_v50 }
 0x257   :  { %v600_v18 = vadd.f32 %v599_v7, %v593_v2  ;;  %v596_v25 = vpop.f32.mrf.mxu0 }
 0x259   :  { %v597_v41 = vpop.f32.mrf.mxu0  ;;  %v601_v42 = vadd.f32 %v600_v18, %v595_v14 }
 0x25b   :  { %602 = vadd.xlane.f32.xlu1 %v601_v42 }
 0x2e4   :  { %v603_v5 = vpop.xlane.xlu1 %602 }
 0x2e5   :  { %v604_v26 = vmul.f32 0.001953125, %v603_v5 }
 0x2e7   :  { %v605_v32 = vsub.f32 %v552_v45, %v604_v26  ;;  %v606_v54 = vsub.f32 %v554_v30, %v604_v26  ;;  %v607_v56 = vsub.f32 %v593_v2, %v604_v26  ;;  %v608_v23 = vsub.f32 %v595_v14, %v604_v26 }
 0x2e9   :  { %v609_v21 = vmul.f32 %v605_v32, %v605_v32  ;;  %v610_v31 = vmul.f32 %v606_v54, %v606_v54  ;;  %v611_v12 = vmul.f32 %v607_v56, %v607_v56  ;;  %v612_v33 = vmul.f32 %v608_v23, %v608_v23 }
 0x2eb   :  { %v613_v17 = vadd.f32 %v610_v31, %v609_v21 }
 0x2ed   :  { %v614_v48 = vadd.f32 %v613_v17, %v611_v12 }
 0x2ef   :  { %v615_v51 = vadd.f32 %v614_v48, %v612_v33 }
 0x2f1   :  { %616 = vadd.xlane.f32.xlu0 %v615_v51 }
 0x307   :  { %633 = vperm.xlu0 %991, %v153_v13  }
 0x37a   :  { %v617_v15 = vpop.xlane.xlu0 %616 }
 0x37b   :  { %v618_v27 = vmul.f32 0.001953125, %v617_v15 }
 0x37d   :  { %v619_v50 = vadd.f32 1e-05, %v618_v27 }
 0x37f   :  { %993 = vrsqrt.f32 %v619_v50 }
 0x382   :  { %v634_v43 = vpop.permute.xlu0 %633 }
 0x38c   :  { %v994_v45 = vpop.eup %993 }
 0x38d   :  { %v621_v30 = vmul.f32 %v994_v45, %v152_v52 }
 0x38f   :  { %624 = vperm.xlu1 %992, %v621_v30  }
 0x40a   :  { %v625_v39 = vpop.permute.xlu1 %624 }
 0x40b   :  { %v627_v62 = vmul.f32 %v625_v39, %v605_v32  ;;  %v628_v2 = vmul.f32 %v625_v39, %v606_v54  ;;  %v629_v7 = vmul.f32 %v625_v39, %v607_v56  ;;  %v630_v5 = vmul.f32 %v625_v39, %v608_v23  ;;  %v645_v54 = vld [vmem:[%s1761_s7] sm:$0xf] }
 0x40d   :  { %v636_v38 = vadd.f32 %v634_v43, %v627_v62  ;;  %v638_v14 = vadd.f32 %v634_v43, %v629_v7  ;;  %v637_v18 = vadd.f32 %v634_v43, %v628_v2  ;;  %v639_v26 = vadd.f32 %v634_v43, %v630_v5 }
 0x40f   :  { %v1545_v25 = vmax.f32 %v636_v38, 0.0  ;;  %v1547_v41 = vmax.f32 %v638_v14, 0.0  ;;  %v1553_v42 = vmax.f32 %v637_v18, 0.0  ;;  %v1567_v32 = vmax.f32 %v639_v26, 0.0 }
 0x411   :  { %764 = vrot.lane.b32.xlu0 %v1547_v41, %s999_s24  ;;  %760 = vrot.lane.b32.xlu1 %v1545_v25, %s999_s24 }
 0x415   :  { %732 = vrot.lane.b32.xlu0 %v1547_v41, %s998_s23  ;;  %762 = vrot.lane.b32.xlu1 %v1553_v42, %s999_s24 }
 0x419   :  { %748 = vrot.lane.b32.xlu0 %v1547_v41, %s1000_s0  ;;  %730 = vrot.lane.b32.xlu1 %v1553_v42, %s998_s23 }
 0x41d   :  { %728 = vrot.lane.b32.xlu0 %v1545_v25, %s998_s23  ;;  %746 = vrot.lane.b32.xlu1 %v1553_v42, %s1000_s0 }
 0x421   :  { %714 = vrot.lane.b32.xlu0 %v1553_v42, %s1001_s25  ;;  %766 = vrot.lane.b32.xlu1 %v1567_v32, %s999_s24 }
 0x425   :  { %734 = vrot.lane.b32.xlu0 %v1567_v32, %s998_s23  ;;  %744 = vrot.lane.b32.xlu1 %v1545_v25, %s1000_s0 }
 0x429   :  { %712 = vrot.lane.b32.xlu0 %v1545_v25, %s1001_s25  ;;  %716 = vrot.lane.b32.xlu1 %v1547_v41, %s1001_s25 }
 0x42d   :  { %682 = vrot.lane.b32.xlu0 %v1553_v42, %s1002_s26  ;;  %750 = vrot.lane.b32.xlu1 %v1567_v32, %s1000_s0 }
 0x431   :  { %698 = vrot.lane.b32.xlu0 %v1553_v42, %s1003_s27  ;;  %680 = vrot.lane.b32.xlu1 %v1545_v25, %s1002_s26 }
 0x435   :  { %686 = vrot.lane.b32.xlu0 %v1567_v32, %s1002_s26  ;;  %696 = vrot.lane.b32.xlu1 %v1545_v25, %s1003_s27 }
 0x439   :  { %648 = vrot.lane.b32.xlu0 %v1545_v25, %s1004_s28  ;;  %718 = vrot.lane.b32.xlu1 %v1567_v32, %s1001_s25 }
 0x43d   :  { %664 = vrot.lane.b32.xlu0 %v1545_v25, %s1005_s29  ;;  %702 = vrot.lane.b32.xlu1 %v1567_v32, %s1003_s27 }
 0x441   :  { %684 = vrot.lane.b32.xlu0 %v1547_v41, %s1002_s26  ;;  %650 = vrot.lane.b32.xlu1 %v1553_v42, %s1004_s28 }
 0x445   :  { %654 = vrot.lane.b32.xlu0 %v1567_v32, %s1004_s28  ;;  %666 = vrot.lane.b32.xlu1 %v1553_v42, %s1005_s29 }
 0x449   :  { %652 = vrot.lane.b32.xlu0 %v1547_v41, %s1004_s28  ;;  %700 = vrot.lane.b32.xlu1 %v1547_v41, %s1003_s27 }
 0x44d   :  { %798 = vperm.xlu0 %991, %v645_v54   ;;  %670 = vrot.lane.b32.xlu1 %v1567_v32, %s1005_s29 }
 0x451   :  { %668 = vrot.lane.b32.xlu1 %v1547_v41, %s1005_s29 }
 0x483   :  { %v765_v56 = vpop.permute.xlu0 %764  ;;  %v761_v23 = vpop.permute.xlu1 %760 }
 0x487   :  { %v733_v21 = vpop.permute.xlu0 %732  ;;  %v763_v31 = vpop.permute.xlu1 %762 }
 0x488   :  { %v769_v12 = vsel %vm443_vm1, %v763_v31, %v765_v56  ;;  %v770_v17 = vsel %vm443_vm1, %v761_v23, %v763_v31 }
 0x489   :  { %v772_v33 = vmul.f32 %v770_v17, %v1359_v37  ;;  %v773_v48 = vmul.f32 %v769_v12, %v1363_v28 }
 0x48b   :  { %v792_v51 = vpack.c.bf16 %v772_v33, %v772_v33  ;;  %v793_v13 = vpack.c.bf16 %v773_v48, %v773_v48  ;;  %v749_v15 = vpop.permute.xlu0 %748  ;;  %v731_v27 = vpop.permute.xlu1 %730 }
 0x48c   :  { %v737_v52 = vsel %vm363_vm4, %v731_v27, %v733_v21 }
 0x48d   :  { %977 = vmatprep.subr.msk.bf16.mxu1 %vm504_vm2, %v793_v13  ;;  %v805_v50 = vsel %vm504_vm2, %v792_v51, 0  ;;  %v741_v37 = vmul.f32 %v737_v52, %v1371_v6 }
 0x48e   :  { %823 = vmatpush1.bf16.msra.mxu1 %v805_v50 }
 0x48f   :  { %v729_v45 = vpop.permute.xlu0 %728  ;;  %v747_v30 = vpop.permute.xlu1 %746 }
 0x490   :  { %v753_v39 = vsel %vm403_vm3, %v747_v30, %v749_v15  ;;  %v738_v5 = vsel %vm363_vm4, %v729_v45, %v731_v27 }
 0x491   :  { %v757_v28 = vmul.f32 %v753_v39, %v1389_v55 }
 0x493   :  { %v715_v62 = vpop.permute.xlu0 %714  ;;  %v767_v2 = vpop.permute.xlu1 %766  ;;  %v789_v7 = vpack.c.bf16 %v757_v28, %v741_v37 }
 0x494   :  { %v768_v43 = vsel %vm443_vm1, %v765_v56, %v767_v2  ;;  %v771_v38 = vsel %vm443_vm1, %v767_v2, %v761_v23  ;;  %v740_v56 = vmul.f32 %v738_v5, %v1367_v29 }
 0x495   :  { %v774_v14 = vmul.f32 %v768_v43, %v1224_v46  ;;  %v775_v18 = vmul.f32 %v771_v38, %v1228_v47  ;;  %824 = vmatprep.subr.bf16.mxu1 %v789_v7 }
 0x497   :  { %v794_v6 = vpack.c.bf16 %v774_v14, %v774_v14  ;;  %v795_v26 = vpack.c.bf16 %v775_v18, %v775_v18  ;;  %v735_v55 = vpop.permute.xlu0 %734  ;;  %v745_v54 = vpop.permute.xlu1 %744 }
 0x498   :  { %v754_v31 = vsel %vm403_vm3, %v745_v54, %v747_v30  ;;  %v739_v13 = vsel %vm363_vm4, %v735_v55, %v729_v45 }
 0x499   :  { %v756_v12 = vmul.f32 %v754_v31, %v1381_v8  ;;  %979 = vmatprep.subr.msk.bf16.mxu0 %vm504_vm2, %v795_v26  ;;  %v811_v46 = vsel %vm504_vm2, %v794_v6, 0  ;;  %v736_v8 = vsel %vm363_vm4, %v733_v21, %v735_v55  ;;  %v743_v37 = vmul.f32 %v739_v13, %v1272_v0 }
 0x49a   :  { %864 = vmatpush1.bf16.msra.mxu0 %v811_v46 }
 0x49b   :  { %v788_v47 = vpack.c.bf16 %v756_v12, %v740_v56  ;;  %v713_v23 = vpop.permute.xlu0 %712  ;;  %v717_v17 = vpop.permute.xlu1 %716 }
 0x49c   :  { %v722_v33 = vsel %vm323_vm5, %v713_v23, %v715_v62  ;;  %v721_v48 = vsel %vm323_vm5, %v715_v62, %v717_v17 }
 0x49d   :  { %v724_v51 = vmul.f32 %v722_v33, %v1399_v22  ;;  %v725_v29 = vmul.f32 %v721_v48, %v1396_v11  ;;  %825 = vmatpush1.bf16.msra.mxu1 %v788_v47  ;;  %v742_v11 = vmul.f32 %v736_v8, %v1268_v63 }
 0x49f   :  { %v784_v27 = vpack.c.bf16 %v724_v51, %v1545_v25  ;;  %v683_v50 = vpop.permute.xlu0 %682  ;;  %v751_v52 = vpop.permute.xlu1 %750  ;;  %v785_v30 = vpack.c.bf16 %v725_v29, %v1553_v42 }
 0x4a0   :  { %v752_v39 = vsel %vm403_vm3, %v749_v15, %v751_v52  ;;  %v755_v22 = vsel %vm403_vm3, %v751_v52, %v745_v54 }
 0x4a1   :  { %v758_v21 = vmul.f32 %v752_v39, %v1257_v60  ;;  %v759_v45 = vmul.f32 %v755_v22, %v1261_v61  ;;  %826 = vmatprep.subr.bf16.mxu1 %v785_v30 }
 0x4a2   :  { %827 = vmatpush1.bf16.msra.mxu1 %v784_v27 }
 0x4a3   :  { %v790_v25 = vpack.c.bf16 %v758_v21, %v742_v11  ;;  %v699_v28 = vpop.permute.xlu0 %698  ;;  %v681_v62 = vpop.permute.xlu1 %680  ;;  %v791_v42 = vpack.c.bf16 %v759_v45, %v743_v37 }
 0x4a4   :  { %v690_v15 = vsel %vm243_vm6, %v681_v62, %v683_v50 }
 0x4a5   :  { %865 = vmatprep.subr.bf16.mxu0 %v791_v42  ;;  %v693_v60 = vmul.f32 %v690_v15, %v1444_v10  ;;  %v644_v42 = vld [vmem:[%s1762_s6] sm:$0x3] }
 0x4a6   :  { %866 = vmatpush1.bf16.msra.mxu0 %v790_v25 }
 0x4a7   :  { %v687_v2 = vpop.permute.xlu0 %686  ;;  %v697_v7 = vpop.permute.xlu1 %696 }
 0x4a8   :  { %v706_v63 = vsel %vm283_vm7, %v697_v7, %v699_v28  ;;  %v691_v26 = vsel %vm243_vm6, %v687_v2, %v681_v62 }
 0x4a9   :  { %v709_v61 = vmul.f32 %v706_v63, %v1453_v49  ;;  %v692_v56 = vmul.f32 %v691_v26, %v1423_v58 }
 0x4ab   :  { %v649_v0 = vpop.permute.xlu0 %648  ;;  %v719_v43 = vpop.permute.xlu1 %718  ;;  %v781_v38 = vpack.c.bf16 %v709_v61, %v693_v60 }
 0x4ac   :  { %v720_v14 = vsel %vm323_vm5, %v717_v17, %v719_v43  ;;  %v723_v18 = vsel %vm323_vm5, %v719_v43, %v713_v23 }
 0x4ad   :  { %v726_v5 = vmul.f32 %v720_v14, %v1308_v19  ;;  %v727_v6 = vmul.f32 %v723_v18, %v1311_v20  ;;  %828 = vmatprep.subr.bf16.mxu1 %v781_v38 }
 0x4af   :  { %v786_v10 = vpack.c.bf16 %v726_v5, %v1547_v41  ;;  %v665_v49 = vpop.permute.xlu0 %664  ;;  %v703_v55 = vpop.permute.xlu1 %702  ;;  %v787_v54 = vpack.c.bf16 %v727_v6, %v1567_v32 }
 0x4b0   :  { %v707_v31 = vsel %vm283_vm7, %v703_v55, %v697_v7 }
 0x4b1   :  { %v708_v12 = vmul.f32 %v707_v31, %v1429_v1  ;;  %867 = vmatprep.subr.bf16.mxu0 %v787_v54  ;;  %v647_v54 = vld [vmem:[%s1761_s7 + $0x8] sm:$0xf] }
 0x4b2   :  { %868 = vmatpush1.bf16.msra.mxu0 %v786_v10 }
 0x4b3   :  { %v780_v19 = vpack.c.bf16 %v708_v12, %v692_v56  ;;  %v685_v20 = vpop.permute.xlu0 %684  ;;  %v651_v46 = vpop.permute.xlu1 %650 }
 0x4b4   :  { %v658_v41 = vsel %vm164_vm9, %v649_v0, %v651_v46  ;;  %v688_v1 = vsel %vm243_vm6, %v685_v20, %v687_v2  ;;  %v689_v33 = vsel %vm243_vm6, %v683_v50, %v685_v20 }
 0x4b5   :  { %829 = vmatpush1.bf16.msra.mxu1 %v780_v19  ;;  %v661_v23 = vmul.f32 %v658_v41, %v1466_v59  ;;  %v694_v13 = vmul.f32 %v689_v33, %v1448_v36  ;;  %v695_v59 = vmul.f32 %v688_v1, %v1323_v24 }
 0x4b7   :  { %v667_v47 = vpop.permute.xlu1 %666  ;;  %v655_v17 = vpop.permute.xlu0 %654 }
 0x4b8   :  { %v674_v32 = vsel %vm203_vm8, %v665_v49, %v667_v47  ;;  %v659_v50 = vsel %vm164_vm9, %v655_v17, %v649_v0 }
 0x4b9   :  { %v677_v58 = vmul.f32 %v674_v32, %v1475_v44  ;;  %v660_v37 = vmul.f32 %v659_v50, %v1478_v35 }
 0x4bb   :  { %v701_v48 = vpop.permute.xlu1 %700  ;;  %v777_v51 = vpack.c.bf16 %v677_v58, %v661_v23  ;;  %v653_v52 = vpop.permute.xlu0 %652 }
 0x4bc   :  { %v704_v29 = vsel %vm283_vm7, %v701_v48, %v703_v55  ;;  %v705_v8 = vsel %vm283_vm7, %v699_v28, %v701_v48  ;;  %v656_v24 = vsel %vm164_vm9, %v653_v52, %v655_v17 }
 0x4bd   :  { %v710_v44 = vmul.f32 %v705_v8, %v1457_v53  ;;  %v711_v27 = vmul.f32 %v704_v29, %v1336_v34  ;;  %830 = vmatprep.subr.bf16.mxu1 %v777_v51  ;;  %v657_v34 = vsel %vm164_vm9, %v651_v46, %v653_v52 }
 0x4be   :  { %v662_v35 = vmul.f32 %v657_v34, %v1505_v3 }
 0x4bf   :  { %v782_v30 = vpack.c.bf16 %v710_v44, %v694_v13  ;;  %v671_v39 = vpop.permute.xlu1 %670  ;;  %v783_v22 = vpack.c.bf16 %v711_v27, %v695_v59  ;;  %v646_v44 = vld [vmem:[%s1761_s7 + $0x4] sm:$0xf] }
 0x4c0   :  { %v675_v11 = vsel %vm203_vm8, %v671_v39, %v665_v49 }
 0x4c1   :  { %v676_v36 = vmul.f32 %v675_v11, %v1440_v9  ;;  %869 = vmatprep.subr.bf16.mxu0 %v783_v22  ;;  %v663_v9 = vmul.f32 %v656_v24, %v1508_v4 }
 0x4c2   :  { %870 = vmatpush1.bf16.msra.mxu0 %v782_v30 }
 0x4c3   :  { %v776_v53 = vpack.c.bf16 %v676_v36, %v660_v37  ;;  %v669_v21 = vpop.permute.xlu1 %668 }
 0x4c4   :  { %v672_v45 = vsel %vm203_vm8, %v669_v21, %v671_v39  ;;  %v673_v25 = vsel %vm203_vm8, %v667_v47, %v669_v21 }
 0x4c5   :  { %v678_v28 = vmul.f32 %v673_v25, %v1499_v57  ;;  %v679_v62 = vmul.f32 %v672_v45, %v1502_v16  ;;  %831 = vmatpush1.bf16.msra.mxu1 %v776_v53 }
 0x4c7   :  { %v778_v15 = vpack.c.bf16 %v678_v28, %v662_v35  ;;  %v779_v2 = vpack.c.bf16 %v679_v62, %v663_v9 }
 0x4c8   :  { %978 = vmatmul.mubr.msk.bf16.vlgmr.msra.gmra.mxu1 %vm500_vm10, %v644_v42  ;;  %v799_v40 = vpop.permute.xlu0 %798 }
 0x4c9   :  { %871 = vmatprep.subr.bf16.mxu0 %v779_v2 }
 0x4ca   :  { %872 = vmatpush1.bf16.msra.mxu0 %v778_v15 }
 0x4cd   :  { %980 = vmatmul.mubr.msk.bf16.vlgmr.msra.gmra.mxu0 %vm500_vm10, %v644_v42 }
 0x588   :  { %v850_v3 = vpop.f32.mrf.mxu1 }
 0x589   :  { %v851_v4 = vadd.f32 %v850_v3, %v799_v40 }
 0x58a   :  { %v852_v7 = vpop.f32.mrf.mxu1 }
 0x58b   :  { %v853_v57 = vadd.f32 %v852_v7, %v799_v40  ;;  %v898_v16 = vsel %vm504_vm2, %v851_v4, 0.0 }
 0x58c   :  { %v854_v63 = vpop.f32.mrf.mxu1 }
 0x58d   :  { %v899_v60 = vsel %vm504_vm2, %v853_v57, 0.0  ;;  %v891_v61 = vpop.f32.mrf.mxu0 }
 0x58e   :  { %v900_v0 = vadd.f32 %v899_v60, %v898_v16  ;;  %v892_v43 = vadd.f32 %v891_v61, %v799_v40  ;;  %v855_v38 = vpop.f32.mrf.mxu1 }
 0x58f   :  { %v893_v14 = vpop.f32.mrf.mxu0 }
 0x590   :  { %v901_v18 = vsel %vm504_vm2, %v892_v43, 0.0  ;;  %v894_v5 = vadd.f32 %v893_v14, %v799_v40 }
 0x591   :  { %v895_v6 = vpop.f32.mrf.mxu0  ;;  %v902_v26 = vadd.f32 %v901_v18, %v900_v0 }
 0x592   :  { %v903_v10 = vsel %vm504_vm2, %v894_v5, 0.0 }
 0x593   :  { %v896_v49 = vpop.f32.mrf.mxu0  ;;  %v904_v55 = vadd.f32 %v903_v10, %v902_v26 }
 0x595   :  { %905 = vadd.xlane.f32.xlu1 %v904_v55 }
 0x5a6   :  { %940 = vperm.xlu1 %992, %v647_v54  }
 0x61e   :  { %v906_v31 = vpop.xlane.xlu1 %905 }
 0x61f   :  { %v907_v56 = vmul.f32 0.001953125, %v906_v31 }
 0x621   :  { %v908_v12 = vsub.f32 %v851_v4, %v907_v56  ;;  %v909_v19 = vsub.f32 %v853_v57, %v907_v56  ;;  %v910_v20 = vsub.f32 %v892_v43, %v907_v56  ;;  %v911_v46 = vsub.f32 %v894_v5, %v907_v56 }
 0x622   :  { %v941_v37 = vpop.permute.xlu1 %940 }
 0x623   :  { %v912_v41 = vmul.f32 %v908_v12, %v908_v12  ;;  %v913_v47 = vmul.f32 %v909_v19, %v909_v19  ;;  %v914_v32 = vmul.f32 %v910_v20, %v910_v20  ;;  %v915_v23 = vmul.f32 %v911_v46, %v911_v46 }
 0x625   :  { %v916_v17 = vsel %vm504_vm2, %v912_v41, 0.0  ;;  %v917_v58 = vsel %vm504_vm2, %v913_v47, 0.0  ;;  %v919_v33 = vsel %vm504_vm2, %v914_v32, 0.0  ;;  %v921_v51 = vsel %vm504_vm2, %v915_v23, 0.0 }
 0x626   :  { %v918_v1 = vadd.f32 %v917_v58, %v916_v17 }
 0x628   :  { %v920_v48 = vadd.f32 %v919_v33, %v918_v1 }
 0x62a   :  { %v922_v29 = vadd.f32 %v921_v51, %v920_v48 }
 0x62c   :  { %923 = vadd.xlane.f32.xlu0 %v922_v29 }
 0x6b5   :  { %v924_v8 = vpop.xlane.xlu0 %923 }
 0x6b6   :  { %v925_v13 = vmul.f32 0.001953125, %v924_v8 }
 0x6b8   :  { %v926_v59 = vadd.f32 1e-05, %v925_v13 }
 0x6ba   :  { %995 = vrsqrt.f32 %v926_v59 }
 0x6c7   :  { %v996_v27 = vpop.eup %995 }
 0x6c8   :  { %v928_v50 = vmul.f32 %v996_v27, %v646_v44 }
 0x6ca   :  { %931 = vperm.xlu0 %991, %v928_v50  }
 0x745   :  { %v932_v52 = vpop.permute.xlu0 %931 }
 0x746   :  { %v934_v30 = vmul.f32 %v932_v52, %v908_v12  ;;  %v935_v39 = vmul.f32 %v932_v52, %v909_v19  ;;  %v936_v22 = vmul.f32 %v932_v52, %v910_v20  ;;  %v937_v11 = vmul.f32 %v932_v52, %v911_v46 }
 0x748   :  { %v943_v36 = vadd.f32 %v941_v37, %v934_v30  ;;  %v944_v24 = vadd.f32 %v941_v37, %v935_v39  ;;  %v945_v34 = vadd.f32 %v941_v37, %v936_v22  ;;  %v946_v53 = vadd.f32 %v941_v37, %v937_v11 }
 0x74a   :  { %v947_v21 = vmax.f32 %v943_v36, 0.0  ;;  %v948_v45 = vmax.f32 %v944_v24, 0.0  ;;  %v949_v25 = vmax.f32 %v945_v34, 0.0  ;;  %v950_v35 = vmax.f32 %v946_v53, 0.0 }
 0x74c   :  { %951 = vst [vmem:[%s1763_s8] sm:$0xf] %v947_v21  ;;  %952 = vst [vmem:[%s1763_s8 + $0x8] sm:$0xf] %v948_v45  ;;  %v955_v9 = vrot.slane %v949_v25, 4  ;;  %v956_v28 = vrot.slane %v950_v35, 4 }
 0x74e   :  { %959 = vst [vmem:[%s1763_s8] sm:$0xf0] %v955_v9  ;;  %960 = vst [vmem:[%s1763_s8 + $0x8] sm:$0xf0] %v956_v28 }

</bundles_post_ra>
